<compile_context>
chip_gen: v7x
topology: tpu7x:2x2x1
jax: 0.10.0
libtpu: 0.0.40
codegen_flags: <defaults>
</compile_context>

<pallas_src>
import jax
import jax.numpy as jnp
from jax.experimental import pallas as pl
from jax.experimental.pallas import tpu as pltpu


def _pos_emb_copy_kernel(table_ref, out_ref, sem):
    # table_ref: (seq_len, model_dim) raw ref (no auto-DMA, memory_space=ANY)
    # out_ref:   (S, model_dim)       raw ref (memory_space=ANY)
    # Single DMA of the first S rows of the table into the output; the data
    # never round-trips through vregs.
    sl = out_ref.shape[0]
    cp = pltpu.make_async_copy(table_ref.at[pl.ds(0, sl), :], out_ref, sem)
    cp.start()
    cp.wait()


def learned_position_embeddings(x, emb_weight):
    """Return emb_weight[0:x.shape[1], :] via a single-DMA Pallas kernel.

    x:          (B, S, ...)  -- only S = x.shape[1] is used (mirrors forward)
    emb_weight: (seq_len, model_dim) float32 embedding table
    """
    sl = x.shape[1]
    seq_len, model_dim = emb_weight.shape
    assert 0 < sl <= seq_len

    return pl.pallas_call(
        _pos_emb_copy_kernel,
        out_shape=jax.ShapeDtypeStruct((sl, model_dim), emb_weight.dtype),
        in_specs=[pl.BlockSpec(memory_space=pl.ANY)],
        out_specs=pl.BlockSpec(memory_space=pl.ANY),
        scratch_shapes=[pltpu.SemaphoreType.DMA],
    )(emb_weight)


def get_fixed_embedding(ind, emb_weight):
    """Mirror of LearnedPositionEmbeddings.get_fixed_embedding -> (1, 1, D)."""
    # Tiny single-row lookup; plain JAX glue (not a hot path worth a kernel).
    return emb_weight[ind][None, None, :]


if __name__ == "__main__":
    key = jax.random.PRNGKey(0)

    # Module hyperparameters (small, consistent with the forward pass).
    SEQ_LEN = 64      # embedding table rows ("seq_len" in __init__)
    MODEL_DIM = 32    # "model_dim" in __init__
    INIT = 0.02

    B, S = 2, 8       # input x: (batch, sequence, model_dim)

    k_w, k_x = jax.random.split(key)
    # Deterministic init matching torch: normal(mean=0, std=init).
    emb_weight = (jax.random.normal(k_w, (SEQ_LEN, MODEL_DIM), jnp.float32)
                  * INIT)
    x = jax.random.normal(k_x, (B, S, MODEL_DIM), jnp.float32)

    out = learned_position_embeddings(x, emb_weight)
    out = jax.block_until_ready(out)

    # Reference check: forward(x) == emb_weight[:S, :]
    ref = emb_weight[:S, :]
    assert out.shape == (S, MODEL_DIM)
    assert out.dtype == jnp.float32
    assert jnp.array_equal(out, ref)

    # Also exercise a non-multiple-of-8 sequence length (no tiling constraint
    # remains in the new design).
    S2 = 11
    x2 = jax.random.normal(k_x, (B, S2, MODEL_DIM), jnp.float32)
    out2 = jax.block_until_ready(learned_position_embeddings(x2, emb_weight))
    assert out2.shape == (S2, MODEL_DIM)
    assert jnp.array_equal(out2, emb_weight[:S2, :])

    # Sanity check for get_fixed_embedding (plain-JAX helper).
    fixed = get_fixed_embedding(3, emb_weight)
    assert fixed.shape == (1, 1, MODEL_DIM)
    assert jnp.array_equal(fixed[0, 0], emb_weight[3])

    print("KERNEL_OK")
</pallas_src>

<mosaic_0001>
module attributes {stable_mosaic.version = 11 : i64} {
  func.func @_pos_emb_copy_kernel(%arg0: memref<64x32xf32, #tpu.memory_space<any>>, %arg1: memref<8x32xf32, #tpu.memory_space<any>>, %arg2: memref<!tpu.dma_semaphore, #tpu.memory_space<semaphore_mem>>) attributes {dimension_semantics = [], scalar_prefetch = 0 : i64, scratch_operands = 1 : i64, tpu.core_type = #tpu.core_type<tc>} {
    %c0_i32 = arith.constant 0 : i32
    %c0_i32_0 = arith.constant 0 : i32
    %0 = tpu.memref_slice %arg0[%c0_i32, %c0_i32_0] : memref<64x32xf32, #tpu.memory_space<any>> -> memref<8x32xf32, #tpu.memory_space<any>>
    tpu.enqueue_dma source(%0 : memref<8x32xf32, #tpu.memory_space<any>>) target(%arg1 : memref<8x32xf32, #tpu.memory_space<any>>) target_semaphore(%arg2 : memref<!tpu.dma_semaphore, #tpu.memory_space<semaphore_mem>>)
    %c0_i32_1 = arith.constant 0 : i32
    %c0_i32_2 = arith.constant 0 : i32
    %1 = tpu.memref_slice %arg0[%c0_i32_1, %c0_i32_2] : memref<64x32xf32, #tpu.memory_space<any>> -> memref<8x32xf32, #tpu.memory_space<any>>
    tpu.wait_dma2 semaphore(%arg2 : memref<!tpu.dma_semaphore, #tpu.memory_space<semaphore_mem>>) src(%1 : memref<8x32xf32, #tpu.memory_space<any>>) dst(%arg1 : memref<8x32xf32, #tpu.memory_space<any>>)
    return
  }
}

</mosaic_0001>

<bundles_post_ra>
// kernel: tpu_custom_call.1
= control target key start
LH: loop header
LB: loop body
LE: loop exit
PB: predicated region body
PF: predicated region fallthrough
CT: control target
= control target key end

     0   :  { %s76_s0 = inlined_call_operand.vmem [shape: f32[64,32], index: 0, kind: input, shape index: {}]   ;;  %s77_s1 = inlined_call_operand.hbm [shape: f32[8,32], index: 1, kind: output, shape index: {}]  }
   0x1   :  { %s13_s8 = sshll.u32 %s76_s0, 4  ;;  %s14_s8 = int_to_ptr.vmem [resolvable:$true] %s13_s8 }
   0x2   :  { %s27_s9 = scalar_lea.vmem %s14_s8, 128  ;;  %s31_s10 = scalar_lea.vmem %s14_s8, 1024 }
   0x3   :  { %p28_p0 = scmp.ne.s32.totalorder %s14_s8, %s27_s9  ;;  %p32_p1 = scmp.lt.s32.totalorder %s14_s8, %s14_s8 }
   0x4   :  { %p33_p2 = scmp.lt.s32.totalorder %s31_s10, %s27_s9 }
   0x6   :  { %p34_p3 = por %p33_p2, %p32_p1 }
   0x8   :  { %p35_p4 = pnand %p34_p3, %p28_p0 }
   0xa   :  { %38 = shalt.err (!%p35_p4)  }
   0xb   :  { %s39_s13 = scalar_lea.hbm %s77_s1, 128 }
   0xc   :  { %p40_p5 = scmp.ne.s32.totalorder %s77_s1, %s39_s13  ;;  %p43_p6 = scmp.lt.u32.totalorder %s39_s13, %s77_s1 }
   0xe   :  { %p45_p7 = pnand %p43_p6, %p40_p5 }
  0x10   :  { %48 = shalt.err (!%p45_p7)  }
  0x11   :  { %16 = dma.vmem_to_hbm [thread:$0]  %s14_s8, 128, %s77_s1, [#allocation2] }
  0x12   :  { %49 = dma.done.wait [#allocation2], 128 }
  0x13   :  { %50 = vsyncadd [#allocation2], 4294967168 }
  0x14   :  { %20 = vsyncmov [#allocation2] }
  0x17   :  { %s21_s19 = vpop.sfrf %20 }
  0x18   :  { %p26_p8 = scmp.ne.s32.totalorder %s21_s19, 0 }
  0x1a   :  { %25 = shalt.err (%p26_p8)  }

</bundles_post_ra>
